<compile_context>
chip_gen: v7x
topology: tpu7x:2x2x1
jax: 0.10.0
libtpu: 0.0.40
codegen_flags: <defaults>
</compile_context>

<pallas_src>
import numpy as np
import jax
import jax.numpy as jnp
from jax.experimental import pallas as pl
from jax.experimental.pallas import tpu as pltpu


def _round_up(x, m):
    return ((x + m - 1) // m) * m


def _pick_hw_tile(hw, cap=4096):
    """Largest multiple of 128 that divides hw (capped); else the full extent."""
    best = None
    t = 128
    while t <= min(hw, cap):
        if hw % t == 0:
            best = t
        t += 128
    return best if best is not None else hw


def _build_tps_constants(load_height, load_width, grid_size):
    """Replicates the deterministic buffers built in TpsGridGen.__init__."""
    gx, gy = np.meshgrid(
        np.linspace(-0.9, 0.9, load_width, dtype=np.float64),
        np.linspace(-0.9, 0.9, load_height, dtype=np.float64),
    )
    gx = gx.astype(np.float32)  # (H, W)
    gy = gy.astype(np.float32)  # (H, W)

    coords = np.linspace(-0.9, 0.9, grid_size, dtype=np.float64)
    p_y_m, p_x_m = np.meshgrid(coords, coords)
    px = p_x_m.reshape(-1).astype(np.float32)  # (N,)
    py = p_y_m.reshape(-1).astype(np.float32)  # (N,)
    N = px.shape[0]

    # compute_L_inverse
    d2 = (px[:, None] - px[None, :]) ** 2 + (py[:, None] - py[None, :]) ** 2
    d2[d2 == 0.0] = 1.0
    K = (d2 * np.log(d2)).astype(np.float32)
    O = np.ones((N, 1), dtype=np.float32)
    P = np.concatenate([O, px[:, None], py[:, None]], axis=1)  # (N, 3)
    Z = np.zeros((3, 3), dtype=np.float32)
    L = np.block([[K, P], [P.T, Z]]).astype(np.float32)        # (N+3, N+3)
    Li = np.linalg.inv(L).astype(np.float32)
    return gx, gy, px, py, Li


def _tps_matmul_kernel(w_ref, u_ref, out_ref):
    # Single batched MXU matmul: (Mp, Kp) @ (Kp, hw_tile) -> (Mp, hw_tile).
    # Affine terms are already folded in via the augmented W / U rows.
    out_ref[...] = jnp.dot(w_ref[...], u_ref[...],
                           preferred_element_type=jnp.float32)


class TpsGridGenPallas:
    def __init__(self, opt):
        H, W, gs = opt["load_height"], opt["load_width"], opt["grid_size"]
        gx, gy, px, py, Li = _build_tps_constants(H, W, gs)
        N = gs * gs
        HW = H * W
        self.H, self.W, self.N, self.HW = H, W, N, HW

        gx_f = gx.reshape(-1)  # (HW,)
        gy_f = gy.reshape(-1)  # (HW,)

        # Batch-invariant radial basis U (N, HW), computed once on the host
        # with the same exact-zero clamp as the PyTorch module.
        d2 = (gx_f[None, :] - px[:, None]) ** 2 + (gy_f[None, :] - py[:, None]) ** 2
        d2[d2 == 0.0] = 1.0
        u = (d2 * np.log(d2)).astype(np.float32)  # (N, HW)

        # Augmented basis rows: [U ; 1 ; gx ; gy], K zero-padded to sublane mult.
        Kp = _round_up(N + 3, 8)
        u_aug = np.zeros((Kp, HW), dtype=np.float32)
        u_aug[:N] = u
        u_aug[N] = 1.0
        u_aug[N + 1] = gx_f
        u_aug[N + 2] = gy_f
        self.Kp = Kp
        self.u_aug = jnp.asarray(u_aug)                                   # (Kp, HW)

        self.px = jnp.asarray(px)                                         # (N,)
        self.py = jnp.asarray(py)                                         # (N,)
        self.li_nn_t = jnp.asarray(np.ascontiguousarray(Li[:N, :N].T))    # (N, N)
        self.li_n3_t = jnp.asarray(np.ascontiguousarray(Li[N:, :N].T))    # (N, 3)
        self.Li = jnp.asarray(Li)                                         # (N+3, N+3)
        self.grid = jnp.asarray(np.stack([gx_f, gy_f], 0))                # (2, HW)

        self.hw_tile = _pick_hw_tile(HW)

    def __call__(self, theta):
        """theta: (B, 2N) float32 -> warped grid (B, H, W, 2)."""
        B = theta.shape[0]
        N, H, W, HW, Kp = self.N, self.H, self.W, self.HW, self.Kp
        theta = theta.astype(jnp.float32)

        # Tiny TPS solve for all batches + both channels in plain XLA:
        #   rows 0..B-1 -> x channel, rows B..2B-1 -> y channel.
        q = jnp.concatenate([theta[:, :N] + self.px[None, :],
                             theta[:, N:] + self.py[None, :]], axis=0)    # (2B, N)
        w = q @ self.li_nn_t                                              # (2B, N)
        a = q @ self.li_n3_t                                              # (2B, 3)
        w_aug = jnp.concatenate([w, a], axis=1)                           # (2B, N+3)

        # Pad M (=2B) to a sublane multiple and K to Kp; padding rows/cols are
        # zero so they contribute exactly 0.
        Mp = _round_up(2 * B, 8)
        w_pad = jnp.zeros((Mp, Kp), jnp.float32).at[:2 * B, :N + 3].set(w_aug)

        hw_tile = self.hw_tile
        grid = (HW // hw_tile,)

        out = pl.pallas_call(
            _tps_matmul_kernel,
            out_shape=jax.ShapeDtypeStruct((Mp, HW), jnp.float32),
            grid_spec=pltpu.PrefetchScalarGridSpec(
                num_scalar_prefetch=0,
                grid=grid,
                in_specs=[
                    pl.BlockSpec((Mp, Kp), lambda t: (0, 0)),         # W|A (tiny)
                    pl.BlockSpec((Kp, hw_tile), lambda t: (0, t)),    # U|1|gx|gy
                ],
                out_specs=pl.BlockSpec((Mp, hw_tile), lambda t: (0, t)),
            ),
            compiler_params=pltpu.CompilerParams(
                dimension_semantics=("parallel",)),
        )(w_pad, self.u_aug)

        out_x = out[:B].reshape(B, H, W)
        out_y = out[B:2 * B].reshape(B, H, W)
        # channel 0 = x', channel 1 = y'  (same as torch.cat((X', Y'), dim=3))
        return jnp.stack([out_x, out_y], axis=-1)

    def reference(self, theta):
        """Pure-JAX reference (mirrors the PyTorch math) for verification."""
        B = theta.shape[0]
        N, H, W = self.N, self.H, self.W
        Li = self.Li
        px, py = self.px, self.py
        q_x = theta[:, :N] + px[None, :]
        q_y = theta[:, N:] + py[None, :]
        w_x = q_x @ Li[:N, :N].T
        w_y = q_y @ Li[:N, :N].T
        a_x = q_x @ Li[N:, :N].T
        a_y = q_y @ Li[N:, :N].T
        gx, gy = self.grid[0], self.grid[1]
        d2 = (gx[None, :] - px[:, None]) ** 2 + (gy[None, :] - py[:, None]) ** 2
        d2 = jnp.where(d2 == 0.0, 1.0, d2)
        u = d2 * jnp.log(d2)
        out_x = a_x[:, 0:1] + a_x[:, 1:2] * gx[None] + a_x[:, 2:3] * gy[None] + w_x @ u
        out_y = a_y[:, 0:1] + a_y[:, 1:2] * gx[None] + a_y[:, 2:3] * gy[None] + w_y @ u
        return jnp.stack([out_x, out_y], axis=-1).reshape(B, H, W, 2)


if __name__ == "__main__":
    opt = {"load_width": 16, "load_height": 16, "grid_size": 3}
    model = TpsGridGenPallas(opt)

    B = 2
    key = jax.random.PRNGKey(0)
    theta = 0.1 * jax.random.normal(key, (B, 2 * model.N), dtype=jnp.float32)

    warped = model(theta)
    warped = jax.block_until_ready(warped)
    assert warped.shape == (B, opt["load_height"], opt["load_width"], 2)

    ref = jax.block_until_ready(model.reference(theta))
    np.testing.assert_allclose(np.asarray(warped), np.asarray(ref),
                               rtol=5e-3, atol=5e-3)
    print("KERNEL_OK")
</pallas_src>

<mosaic_0001>
module attributes {stable_mosaic.version = 11 : i64} {
  func.func @_tps_matmul_kernel(%arg0: i32, %arg1: memref<8x16xf32, #tpu.memory_space<vmem>>, %arg2: memref<16x256xf32, #tpu.memory_space<vmem>>, %arg3: memref<8x256xf32, #tpu.memory_space<vmem>>) attributes {dimension_semantics = [#tpu.dimension_semantics<parallel>], iteration_bounds = array<i64: 1>, scalar_prefetch = 0 : i64, scratch_operands = 0 : i64, tpu.core_type = #tpu.core_type<tc>, window_params = [{pipeline_mode = #tpu.pipeline_mode<synchronous>, transform_indices = @transform_0, window_bounds = array<i64: 8, 16>}, {transform_indices = @transform_1, window_bounds = array<i64: 16, 256>}, {transform_indices = @transform_2, window_bounds = array<i64: 8, 256>}]} {
    %c0 = arith.constant 0 : index
    %c0_0 = arith.constant 0 : index
    %0 = vector.load %arg1[%c0, %c0_0] : memref<8x16xf32, #tpu.memory_space<vmem>>, vector<8x16xf32>
    %c0_1 = arith.constant 0 : index
    %c0_2 = arith.constant 0 : index
    %1 = vector.load %arg2[%c0_1, %c0_2] : memref<16x256xf32, #tpu.memory_space<vmem>>, vector<16x256xf32>
    %cst = arith.constant dense<0.000000e+00> : vector<8x256xf32>
    %2 = tpu.matmul %0, %1, %cst {dimension_numbers = #tpu.dot_dimension_numbers<[1], [0], [0], [1], [0, 0, 1, 1], [], []>} : vector<8x16xf32>, vector<16x256xf32>, vector<8x256xf32> -> vector<8x256xf32>
    %c0_3 = arith.constant 0 : index
    %c0_4 = arith.constant 0 : index
    %3 = vector.load %arg3[%c0_3, %c0_4] : memref<8x256xf32, #tpu.memory_space<vmem>>, vector<8x256xf32>
    tpu.vector_store %arg3[%c0_3, %c0_4], %2 {strides = array<i32>} : memref<8x256xf32, #tpu.memory_space<vmem>>, vector<8x256xf32>,
    return
  }
  func.func @transform_0(%arg0: i32) -> (i32, i32) {
    %c0_i32 = arith.constant 0 : i32
    %c0_i32_0 = arith.constant 0 : i32
    %c0_i32_1 = arith.constant 0 : i32
    return %c0_i32, %c0_i32_0 : i32, i32
  }
  func.func @transform_1(%arg0: i32) -> (i32, i32) {
    %c0_i32 = arith.constant 0 : i32
    %c0_i32_0 = arith.constant 0 : i32
    return %c0_i32, %arg0 : i32, i32
  }
  func.func @transform_2(%arg0: i32) -> (i32, i32) {
    %c0_i32 = arith.constant 0 : i32
    %c0_i32_0 = arith.constant 0 : i32
    return %c0_i32, %arg0 : i32, i32
  }
}

</mosaic_0001>

<bundles_post_ra>
// kernel: tpu_custom_call.1
= control target key start
LH: loop header
LB: loop body
LE: loop exit
PB: predicated region body
PF: predicated region fallthrough
CT: control target
= control target key end

     0   :  { %7 = vsyncpa [#allocation3], 0  ;;  %s283_s0 = inlined_call_operand.hbm [shape: f32[8,16], index: 0, kind: input, shape index: {}]   ;;  %s284_s1 = inlined_call_operand.hbm [shape: f32[16,256], index: 1, kind: input, shape index: {}]   ;;  %s285_s2 = inlined_call_operand.hbm [shape: f32[8,256], index: 2, kind: output, shape index: {}]  }
   0x1   :  { %8 = vsyncpa [#allocation6], 0 }
   0x2   :  { %9 = vsyncpa [#allocation4], 0  ;;  %s219_s9 = smov [#allocation2]   ;;  %s220_s11 = smov [#allocation5]  }
   0x3   :  { %s16_s10 = sshll.u32 %s219_s9, 4  ;;  %s25_s12 = sshll.u32 %s220_s11, 4  ;;  %s17_s10 = int_to_ptr.vmem [resolvable:$true] %s16_s10  ;;  %s240_s12 = int_to_ptr.vmem [resolvable:$true] %s25_s12 }
   0x4   :  { %s147_s15 = scalar_lea.hbm %s283_s0, 128 }
   0x5   :  { %p148_p0 = scmp.ne.s32.totalorder %s283_s0, %s147_s15  ;;  %p151_p1 = scmp.lt.u32.totalorder %s147_s15, %s283_s0 }
   0x7   :  { %p153_p2 = pnand %p151_p1, %p148_p0 }
   0x9   :  { %156 = shalt.err (!%p153_p2)
}
   0xa   :  { %s157_s20 = scalar_lea.vmem %s17_s10, 128  ;;  %p162_p4 = scmp.lt.s32.totalorder %s17_s10, %s17_s10 }
   0xb   :  { %p158_p3 = scmp.ne.s32.totalorder %s17_s10, %s157_s20  ;;  %p163_p5 = scmp.lt.s32.totalorder %s157_s20, %s157_s20 }
   0xd   :  { %p164_p6 = por %p163_p5, %p162_p4 }
   0xf   :  { %p165_p7 = pnand %p164_p6, %p158_p3 }
  0x11   :  { %168 = shalt.err (!%p165_p7)
}
  0x12   :  { %19 = dma.hbm_to_vmem [thread:$0]  %s283_s0, 128, %s17_s10, [#allocation3]  }
  0x13   :  { %s169_s25 = scalar_lea.hbm %s284_s1, 512 }
  0x14   :  { %p170_p8 = scmp.ne.s32.totalorder %s284_s1, %s169_s25  ;;  %p173_p9 = scmp.lt.u32.totalorder %s169_s25, %s284_s1 }
  0x16   :  { %p175_p10 = pnand %p173_p9, %p170_p8 }
  0x18   :  { %178 = shalt.err (!%p175_p10)
}
  0x19   :  { %s179_s30 = scalar_lea.vmem %s240_s12, 512  ;;  %p184_p12 = scmp.lt.s32.totalorder %s240_s12, %s240_s12 }
  0x1a   :  { %p180_p11 = scmp.ne.s32.totalorder %s240_s12, %s179_s30  ;;  %p185_p13 = scmp.lt.s32.totalorder %s179_s30, %s179_s30 }
  0x1c   :  { %p186_p0 = por %p185_p13, %p184_p12 }
  0x1e   :  { %p187_p1 = pnand %p186_p0, %p180_p11 }
  0x20   :  { %190 = shalt.err (!%p187_p1)
}
  0x21   :  { %s221_s0 = smov 256   ;;  %s222_s3 = smov 16  }
  0x22   :  { %31 = dma.hbm_to_vmem [thread:$0]  %s284_s1, 512, %s240_s12, [#allocation6], %s221_s0, %s221_s0, %s222_s3  }
  0x23   :  { %213 = dma.done.wait [#allocation3], 128  }
  0x24   :  { %214 = vsyncadd [#allocation3], 4294967168 }
  0x25   :  { %215 = dma.done.wait [#allocation6], 512  }
  0x26   :  { %216 = vsyncadd [#allocation6], 4294966784  ;;  %v223_v0 = vmov 0.0   ;;  %v40_v1 = vld [vmem:[#allocation5 + $0x8] sm:$0xff]  ;;  %v42_v2 = vld [vmem:[#allocation5 + $0x18] sm:$0xff]  ;;  %vm43_vm0 = vcmask 130048  }
  0x27   :  { %111 = vmatprep.mubr.f32.mxu0 %v223_v0  ;;  %v39_v3 = vld [vmem:[#allocation5] sm:$0xff]  ;;  %v137_v4 = vpack.c.bf16 %v42_v2, %v40_v1  ;;  %v41_v5 = vld [vmem:[#allocation5 + $0x10] sm:$0xff]  ;;  %v38_v7 = vld [vmem:[#allocation2] sm:$0xff]  ;;  %s224_s6 = smov [#allocation7]  }
  0x28   :  { %v139_v6 = vpack.c.bf16 %v41_v5, %v39_v3  ;;  %s126_s7 = sshll.u32 %s224_s6, 4  ;;  %s127_s7 = int_to_ptr.vmem [resolvable:$true] %s126_s7 }
  0x29   :  { %138 = vmatprep.subr.bf16.mxu0 %v137_v4  ;;  %s191_s1 = scalar_lea.vmem %s127_s7, 256  ;;  %p196_p3 = scmp.lt.s32.totalorder %s127_s7, %s127_s7 }
  0x2a   :  { %140 = vmatpush1.bf16.msra.mxu0 %v139_v6  ;;  %p192_p2 = scmp.ne.s32.totalorder %s127_s7, %s191_s1  ;;  %p197_p4 = scmp.lt.s32.totalorder %s191_s1, %s191_s1 }
  0x2c   :  { %p198_p5 = por %p197_p4, %p196_p3 }
  0x2d   :  { %136 = vmatmul.mubr.msk.f32.vlgmr.msra.gmra.mrb[0].mxu0 %vm43_vm0, %v38_v7 }
  0x2e   :  { %p199_p6 = pnand %p198_p5, %p192_p2 }
 0x100   :  { %v113_v8 = vpop.f32.mrb[0].mxu0 }
 0x101   :  { %118 = vst [vmem:[#allocation7] sm:$0xff] %v113_v8  ;;  %v115_v9 = vpop.f32.mrb[1].mxu0 }
 0x102   :  { %119 = vst [vmem:[#allocation7 + $0x8] sm:$0xff] %v115_v9 }
 0x103   :  { %202 = shalt.err (!%p199_p6)
}
 0x104   :  { %s203_s10 = scalar_lea.hbm %s285_s2, 256 }
 0x105   :  { %p204_p7 = scmp.ne.s32.totalorder %s285_s2, %s203_s10  ;;  %p207_p8 = scmp.lt.u32.totalorder %s203_s10, %s285_s2 }
 0x107   :  { %p209_p9 = pnand %p207_p8, %p204_p7 }
 0x109   :  { %212 = shalt.err (!%p209_p9)
}
 0x10a   :  { %129 = dma.vmem_to_hbm [thread:$0]  %s127_s7, 256, %s285_s2, [#allocation4]  }
 0x10b   :  { %217 = dma.done.wait [#allocation4], 256  }
 0x10c   :  { %218 = vsyncadd [#allocation4], 4294967040 }
 0x10d   :  { %133 = vsyncpa [#allocation3], 1 }
 0x10e   :  { %134 = vsyncpa [#allocation6], 1 }
 0x10f   :  { %135 = vsyncpa [#allocation4], 1 }

</bundles_post_ra>
